<compile_context>
chip_gen: v5e
topology: v5e:2x2
jax: 0.10.0
libtpu: 0.0.40
codegen_flags: <defaults>
</compile_context>

<pallas_src>
import math

import jax
import jax.numpy as jnp
from jax.experimental import pallas as pl
from jax.experimental.pallas import tpu as pltpu


def dqn_mlp_kernel(x_ref, w1_ref, b1_ref, w2_ref, b2_ref, w3_ref, b3_ref, out_ref):
    """fc1 -> relu -> fc2 -> relu -> fc3 for one batch tile, all in VMEM."""
    # bf16 operands for the MXU; accumulate in f32.
    x = x_ref[...].astype(jnp.bfloat16)

    h1 = jnp.dot(x, w1_ref[...], preferred_element_type=jnp.float32) + b1_ref[...]
    h1 = jnp.maximum(h1, 0.0).astype(jnp.bfloat16)

    h2 = jnp.dot(h1, w2_ref[...], preferred_element_type=jnp.float32) + b2_ref[...]
    h2 = jnp.maximum(h2, 0.0).astype(jnp.bfloat16)

    q = jnp.dot(h2, w3_ref[...], preferred_element_type=jnp.float32) + b3_ref[...]
    out_ref[...] = q.astype(out_ref.dtype)


def dqn_forward(x, params, *, batch_tile=None):
    """Run the DQNNetwork forward pass as a single batch-tiled Pallas TPU kernel."""
    w1, b1, w2, b2, w3, b3 = params
    batch, state_size = x.shape
    hidden_size = w1.shape[1]
    action_size = w3.shape[1]

    # Pick a batch tile: multiple of 8 (f32 sublane), capped at 512 so the fused
    # (TB, hidden) f32 intermediates don't blow vreg pressure.
    padded_batch = max(8, ((batch + 7) // 8) * 8)
    if batch_tile is None:
        batch_tile = min(512, padded_batch)
    batch_tile = max(8, (batch_tile // 8) * 8)
    padded_batch = ((batch + batch_tile - 1) // batch_tile) * batch_tile
    if padded_batch != batch:
        x = jnp.pad(x, ((0, padded_batch - batch), (0, 0)))

    grid = (padded_batch // batch_tile,)

    # Weights/biases: full-array blocks with constant index_maps -> VMEM-resident
    # across all grid steps (no re-DMA). Activations/outputs: tiled over batch.
    resident = lambda shp: pl.BlockSpec(shp, lambda i: (0, 0))

    param_bytes = sum(int(p.size) * p.dtype.itemsize for p in params)
    flops = 2 * padded_batch * (
        state_size * hidden_size + hidden_size * hidden_size + hidden_size * action_size
    )
    bytes_accessed = (
        int(x.size) * x.dtype.itemsize
        + padded_batch * action_size * 4
        + param_bytes
    )

    out = pl.pallas_call(
        dqn_mlp_kernel,
        out_shape=jax.ShapeDtypeStruct((padded_batch, action_size), jnp.float32),
        grid=grid,
        in_specs=[
            pl.BlockSpec((batch_tile, state_size), lambda i: (i, 0)),
            resident(w1.shape), resident(b1.shape),
            resident(w2.shape), resident(b2.shape),
            resident(w3.shape), resident(b3.shape),
        ],
        out_specs=pl.BlockSpec((batch_tile, action_size), lambda i: (i, 0)),
        compiler_params=pltpu.CompilerParams(
            dimension_semantics=("parallel",),  # shards batch tiles across v7x's 2 TCs
        ),
        cost_estimate=pl.CostEstimate(
            flops=flops, transcendentals=0, bytes_accessed=bytes_accessed
        ),
    )(x, w1, b1, w2, b2, w3, b3)

    return out[:batch]


def init_params(key, state_size, action_size, hidden_size=64):
    """Xavier-uniform weights (stored (in, out), bf16); biases filled with 0.01 (f32)."""
    def xavier(k, fan_in, fan_out):
        bound = math.sqrt(6.0 / (fan_in + fan_out))
        # PyTorch weight is (out, in); sample in that shape then transpose so the
        # kernel can do x @ W directly. Cast to bf16 for the MXU.
        w = jax.random.uniform(k, (fan_out, fan_in), jnp.float32, -bound, bound)
        return w.T.astype(jnp.bfloat16)

    k1, k2, k3 = jax.random.split(key, 3)
    w1 = xavier(k1, state_size, hidden_size)
    b1 = jnp.full((1, hidden_size), 0.01, jnp.float32)
    w2 = xavier(k2, hidden_size, hidden_size)
    b2 = jnp.full((1, hidden_size), 0.01, jnp.float32)
    w3 = xavier(k3, hidden_size, action_size)
    b3 = jnp.full((1, action_size), 0.01, jnp.float32)
    return (w1, b1, w2, b2, w3, b3)


def reference_forward(x, params):
    """Pure-JAX reference with the same bf16-operand / f32-accumulate path."""
    w1, b1, w2, b2, w3, b3 = params
    xb = x.astype(jnp.bfloat16)
    h1 = jnp.maximum(jnp.dot(xb, w1, preferred_element_type=jnp.float32) + b1, 0.0)
    h1 = h1.astype(jnp.bfloat16)
    h2 = jnp.maximum(jnp.dot(h1, w2, preferred_element_type=jnp.float32) + b2, 0.0)
    h2 = h2.astype(jnp.bfloat16)
    return jnp.dot(h2, w3, preferred_element_type=jnp.float32) + b3


if __name__ == "__main__":
    state_size = 16
    action_size = 8
    hidden_size = 64

    key = jax.random.PRNGKey(0)
    k_params, k_x1, k_x2 = jax.random.split(key, 3)
    params = init_params(k_params, state_size, action_size, hidden_size)

    # Small multi-tile batch (exercises the batch grid: 32 rows / 8-row tiles = 4 steps).
    x_big = jax.random.normal(k_x1, (32, state_size), jnp.float32)
    q_big = jax.block_until_ready(dqn_forward(x_big, params, batch_tile=8))
    ref_big = reference_forward(x_big, params)
    assert q_big.shape == (32, action_size)
    assert jnp.allclose(q_big, ref_big, atol=2e-3, rtol=2e-3), "mismatch vs reference (batch=32)"

    # Tiny batch (exercises the pad-to-sublane + slice path).
    x_small = jax.random.normal(k_x2, (2, state_size), jnp.float32)
    q_small = jax.block_until_ready(dqn_forward(x_small, params))
    ref_small = reference_forward(x_small, params)
    assert q_small.shape == (2, action_size)
    assert jnp.allclose(q_small, ref_small, atol=2e-3, rtol=2e-3), "mismatch vs reference (batch=2)"

    print("KERNEL_OK")
</pallas_src>

<mosaic_0001>
module attributes {stable_mosaic.version = 11 : i64} {
  func.func @dqn_mlp_kernel(%arg0: i32, %arg1: memref<8x16xf32, #tpu.memory_space<vmem>>, %arg2: memref<16x64xbf16, #tpu.memory_space<vmem>>, %arg3: memref<1x64xf32, #tpu.memory_space<vmem>>, %arg4: memref<64x64xbf16, #tpu.memory_space<vmem>>, %arg5: memref<1x64xf32, #tpu.memory_space<vmem>>, %arg6: memref<64x8xbf16, #tpu.memory_space<vmem>>, %arg7: memref<1x8xf32, #tpu.memory_space<vmem>>, %arg8: memref<8x8xf32, #tpu.memory_space<vmem>>) attributes {dimension_semantics = [#tpu.dimension_semantics<parallel>], iteration_bounds = array<i64: 4>, scalar_prefetch = 0 : i64, scratch_operands = 0 : i64, tpu.core_type = #tpu.core_type<tc>, window_params = [{transform_indices = @transform_0, window_bounds = array<i64: 8, 16>}, {pipeline_mode = #tpu.pipeline_mode<synchronous>, transform_indices = @transform_1, window_bounds = array<i64: 16, 64>}, {pipeline_mode = #tpu.pipeline_mode<synchronous>, transform_indices = @transform_2, window_bounds = array<i64: 1, 64>}, {pipeline_mode = #tpu.pipeline_mode<synchronous>, transform_indices = @transform_3, window_bounds = array<i64: 64, 64>}, {pipeline_mode = #tpu.pipeline_mode<synchronous>, transform_indices = @transform_4, window_bounds = array<i64: 1, 64>}, {pipeline_mode = #tpu.pipeline_mode<synchronous>, transform_indices = @transform_5, window_bounds = array<i64: 64, 8>}, {pipeline_mode = #tpu.pipeline_mode<synchronous>, transform_indices = @transform_6, window_bounds = array<i64: 1, 8>}, {transform_indices = @transform_7, window_bounds = array<i64: 8, 8>}]} {
    %c0 = arith.constant 0 : index
    %c0_0 = arith.constant 0 : index
    %0 = vector.load %arg1[%c0, %c0_0] : memref<8x16xf32, #tpu.memory_space<vmem>>, vector<8x16xf32>
    %1 = arith.truncf %0 : vector<8x16xf32> to vector<8x16xbf16>
    %c0_1 = arith.constant 0 : index
    %c0_2 = arith.constant 0 : index
    %2 = vector.load %arg2[%c0_1, %c0_2] : memref<16x64xbf16, #tpu.memory_space<vmem>>, vector<16x64xbf16>
    %cst = arith.constant dense<0.000000e+00> : vector<8x64xf32>
    %3 = tpu.matmul %1, %2, %cst {dimension_numbers = #tpu.dot_dimension_numbers<[1], [0], [0], [1], [0, 0, 1, 1], [], []>} : vector<8x16xbf16>, vector<16x64xbf16>, vector<8x64xf32> -> vector<8x64xf32>
    %c0_3 = arith.constant 0 : index
    %c0_4 = arith.constant 0 : index
    %4 = vector.load %arg3[%c0_3, %c0_4] : memref<1x64xf32, #tpu.memory_space<vmem>>, vector<1x64xf32>
    %5 = vector.broadcast %4 : vector<1x64xf32> to vector<8x64xf32>
    %6 = arith.addf %3, %5 : vector<8x64xf32>
    %cst_5 = arith.constant 0.000000e+00 : f32
    %7 = vector.broadcast %cst_5 : f32 to vector<8x64xf32>
    %8 = arith.maximumf %6, %7 : vector<8x64xf32>
    %9 = arith.truncf %8 : vector<8x64xf32> to vector<8x64xbf16>
    %c0_6 = arith.constant 0 : index
    %c0_7 = arith.constant 0 : index
    %10 = vector.load %arg4[%c0_6, %c0_7] : memref<64x64xbf16, #tpu.memory_space<vmem>>, vector<64x64xbf16>
    %cst_8 = arith.constant dense<0.000000e+00> : vector<8x64xf32>
    %11 = tpu.matmul %9, %10, %cst_8 {dimension_numbers = #tpu.dot_dimension_numbers<[1], [0], [0], [1], [0, 0, 1, 1], [], []>} : vector<8x64xbf16>, vector<64x64xbf16>, vector<8x64xf32> -> vector<8x64xf32>
    %c0_9 = arith.constant 0 : index
    %c0_10 = arith.constant 0 : index
    %12 = vector.load %arg5[%c0_9, %c0_10] : memref<1x64xf32, #tpu.memory_space<vmem>>, vector<1x64xf32>
    %13 = vector.broadcast %12 : vector<1x64xf32> to vector<8x64xf32>
    %14 = arith.addf %11, %13 : vector<8x64xf32>
    %cst_11 = arith.constant 0.000000e+00 : f32
    %15 = vector.broadcast %cst_11 : f32 to vector<8x64xf32>
    %16 = arith.maximumf %14, %15 : vector<8x64xf32>
    %17 = arith.truncf %16 : vector<8x64xf32> to vector<8x64xbf16>
    %c0_12 = arith.constant 0 : index
    %c0_13 = arith.constant 0 : index
    %18 = vector.load %arg6[%c0_12, %c0_13] : memref<64x8xbf16, #tpu.memory_space<vmem>>, vector<64x8xbf16>
    %cst_14 = arith.constant dense<0.000000e+00> : vector<8x8xf32>
    %19 = tpu.matmul %17, %18, %cst_14 {dimension_numbers = #tpu.dot_dimension_numbers<[1], [0], [0], [1], [0, 0, 1, 1], [], []>} : vector<8x64xbf16>, vector<64x8xbf16>, vector<8x8xf32> -> vector<8x8xf32>
    %c0_15 = arith.constant 0 : index
    %c0_16 = arith.constant 0 : index
    %20 = vector.load %arg7[%c0_15, %c0_16] : memref<1x8xf32, #tpu.memory_space<vmem>>, vector<1x8xf32>
    %21 = vector.broadcast %20 : vector<1x8xf32> to vector<8x8xf32>
    %22 = arith.addf %19, %21 : vector<8x8xf32>
    %c0_17 = arith.constant 0 : index
    %c0_18 = arith.constant 0 : index
    %23 = vector.load %arg8[%c0_17, %c0_18] : memref<8x8xf32, #tpu.memory_space<vmem>>, vector<8x8xf32>
    tpu.vector_store %arg8[%c0_17, %c0_18], %22 {strides = array<i32>} : memref<8x8xf32, #tpu.memory_space<vmem>>, vector<8x8xf32>,
    return
  }
  func.func @transform_0(%arg0: i32) -> (i32, i32) {
    %c0_i32 = arith.constant 0 : i32
    %c0_i32_0 = arith.constant 0 : i32
    return %arg0, %c0_i32 : i32, i32
  }
  func.func @transform_1(%arg0: i32) -> (i32, i32) {
    %c0_i32 = arith.constant 0 : i32
    %c0_i32_0 = arith.constant 0 : i32
    %c0_i32_1 = arith.constant 0 : i32
    return %c0_i32, %c0_i32_0 : i32, i32
  }
  func.func @transform_2(%arg0: i32) -> (i32, i32) {
    %c0_i32 = arith.constant 0 : i32
    %c0_i32_0 = arith.constant 0 : i32
    %c0_i32_1 = arith.constant 0 : i32
    return %c0_i32, %c0_i32_0 : i32, i32
  }
  func.func @transform_3(%arg0: i32) -> (i32, i32) {
    %c0_i32 = arith.constant 0 : i32
    %c0_i32_0 = arith.constant 0 : i32
    %c0_i32_1 = arith.constant 0 : i32
    return %c0_i32, %c0_i32_0 : i32, i32
  }
  func.func @transform_4(%arg0: i32) -> (i32, i32) {
    %c0_i32 = arith.constant 0 : i32
    %c0_i32_0 = arith.constant 0 : i32
    %c0_i32_1 = arith.constant 0 : i32
    return %c0_i32, %c0_i32_0 : i32, i32
  }
  func.func @transform_5(%arg0: i32) -> (i32, i32) {
    %c0_i32 = arith.constant 0 : i32
    %c0_i32_0 = arith.constant 0 : i32
    %c0_i32_1 = arith.constant 0 : i32
    return %c0_i32, %c0_i32_0 : i32, i32
  }
  func.func @transform_6(%arg0: i32) -> (i32, i32) {
    %c0_i32 = arith.constant 0 : i32
    %c0_i32_0 = arith.constant 0 : i32
    %c0_i32_1 = arith.constant 0 : i32
    return %c0_i32, %c0_i32_0 : i32, i32
  }
  func.func @transform_7(%arg0: i32) -> (i32, i32) {
    %c0_i32 = arith.constant 0 : i32
    %c0_i32_0 = arith.constant 0 : i32
    return %arg0, %c0_i32 : i32, i32
  }
}

</mosaic_0001>

<bundles_post_ra>
// kernel: tpu_custom_call.1
= control target key start
LH: loop header
LB: loop body
LE: loop exit
PB: predicated region body
PF: predicated region fallthrough
CT: control target
= control target key end

     0   :  { %s586_s24 = smov 0   ;;  %s646_s0 = inlined_call_operand.vmem [shape: f32[32,16], index: 0, kind: input, shape index: {}]   ;;  %s647_s1 = inlined_call_operand.vmem [shape: bf16[16,64], index: 1, kind: input, shape index: {}]   ;;  %s648_s2 = inlined_call_operand.vmem [shape: f32[1,64], index: 2, kind: input, shape index: {}]   ;;  %s649_s3 = inlined_call_operand.vmem [shape: bf16[64,64], index: 3, kind: input, shape index: {}]   ;;  %s650_s4 = inlined_call_operand.vmem [shape: f32[1,64], index: 4, kind: input, shape index: {}]   ;;  %s651_s5 = inlined_call_operand.vmem [shape: bf16[64,8], index: 5, kind: input, shape index: {}]   ;;  %s652_s6 = inlined_call_operand.vmem [shape: f32[1,8], index: 6, kind: input, shape index: {}]   ;;  %s653_s7 = inlined_call_operand.vmem [shape: f32[32,8], index: 7, kind: output, shape index: {}]  }
   0x1 LB: > { %s470_s25 = sadd.s32 4294967295, %s544_s24   ;;  %p474_p0 = scmp.ge.s32.totalorder %s544_s24, 1  ;;  %s544_s24 = sphi %s586_s24, %s17_s24  }
   0x2   : > { %p236_p1 = scmp.lt.s32.totalorder %s544_s24, 5 }
   0x4   : > { %p237_p2 = pnand %p474_p0, %p236_p1 }
   0x5   : > { %p266_p3 = scmp.lt.s32.totalorder (!%p237_p2), %s470_s25, 3 }
   0x6   : > { %240 = sbr.rel (%p237_p2) target bundleno = 421 (0x1a5), region = 48 }
   0xb   : > { %v518_v0 = vld [vmem:[%s647_s1] sm:$0xff]  ;;  %v522_v1 = vld [vmem:[%s649_s3 + $0x18] sm:$0xff]  ;;  %s655_s25 = smov (!%p266_p3, %s470_s25), 3  ;;  %v521_v2 = vld [vmem:[%s649_s3 + $0x10] sm:$0xff]  ;;  %vm289_vm0 = vcmask 130048   ;;  %vm344_vm1 = vcmask 523264  }
   0xc   : > { %300 = vmatpush.bf16.msra.mxu0 %v518_v0  ;;  %352 = vmatpush.bf16.msra.mxu1 %v522_v1  ;;  %s475_s9 = sshll.u32 %s655_s25, 3  ;;  %v520_v5 = vld [vmem:[%s649_s3 + $0x8] sm:$0xff]  ;;  %v519_v6 = vld [vmem:[%s649_s3] sm:$0xff]  ;;  %v526_v7 = vld [vmem:[%s651_s5 + $0x18] sm:$0xff]  ;;  %vm415_vm2 = vcmask 64512  }
   0xd   : > { %s269_s12 = scalar_lea.vmem %s646_s0, %s475_s9  ;;  %406 = vmatpush.bf16.msra.mxu2 %v526_v7  ;;  %v525_v8 = vld [vmem:[%s651_s5 + $0x10] sm:$0xff]  ;;  %v535_v9 = vld [vmem:[%s648_s2] ss:$0 sm:$0xff]  ;;  %v524_v15 = vld [vmem:[%s651_s5 + $0x8] sm:$0xff]  ;;  %s273_s13 = scalar_lea.vmem %s653_s7, %s475_s9 }
   0xe   : > { %v275_v3 = vld [vmem:[%s269_s12] sm:$0xff] }
   0xf   : > { %v276_v4 = vpack.c.bf16 %v275_v3, %v275_v3  ;;  %v523_v16 = vld [vmem:[%s651_s5] sm:$0xff] }
  0x10   : > { %353 = vmatpush.bf16.msra.mxu1 %v521_v2  ;;  %v536_v17 = vld [vmem:[%s650_s4] ss:$0 sm:$0xff] }
  0x11   : > { %481 = vmatmul.msk.bf16.vlgmr.msra.gmra.mxu0 %vm289_vm0, %v276_v4  ;;  %407 = vmatpush.bf16.msra.mxu2 %v525_v8  ;;  %v537_v23 = vld [vmem:[%s652_s6] ss:$0 sm:$0xff] }
  0x14   : > { %354 = vmatpush.bf16.msra.mxu1 %v520_v5 }
  0x15   : > { %408 = vmatpush.bf16.msra.mxu2 %v524_v15 }
  0x18   : > { %355 = vmatpush.bf16.msra.mxu1 %v519_v6 }
  0x19   : > { %409 = vmatpush.bf16.msra.mxu2 %v523_v16 }
  0x8e   : > { %v302_v10 = vpop.f32.mrf.mxu0 }
  0x8f   : > { %v303_v11 = vadd.f32 %v535_v9, %v302_v10 }
  0x91   : > { %v306_v12 = vmax.f32 %v303_v11, 0.0 }
  0x93   : > { %v307_v13 = vpack.c.bf16 %v306_v12, %v306_v12 }
  0x95   : > { %498 = vmatmul.msk.bf16.vlgmr.msra.gmra.mxu1 %vm344_vm1, %v307_v13 }
  0x96   : > { %v304_v14 = vpop.f32.mrf.mxu0 }
 0x112   : > { %v357_v18 = vpop.f32.mrf.mxu1 }
 0x113   : > { %v358_v19 = vadd.f32 %v536_v17, %v357_v18 }
 0x115   : > { %v361_v20 = vmax.f32 %v358_v19, 0.0 }
 0x117   : > { %v362_v21 = vpack.c.bf16 %v361_v20, %v361_v20 }
 0x119   : > { %515 = vmatmul.msk.bf16.vlgmr.msra.gmra.mxu2 %vm344_vm1, %v362_v21 }
 0x11a   : > { %v359_v22 = vpop.f32.mrf.mxu1 }
 0x19c   : > { %v411_v24 = vpop.f32.mrf.mxu2 }
 0x19d   : > { %v412_v25 = vadd.f32 %v537_v23, %v411_v24 }
 0x19f   : > { %416 = vst.msk [vmem:[%s273_s13] sm:$0xff] %vm415_vm2, %v412_v25 }
 0x1a4   : > { %v413_v26 = vpop.f32.mrf.mxu2 }
 0x1a5 PF: > { %s17_s24 = sadd.s32 1, %s544_s24  }
 0x1a6   : > { %p14_p4 = scmp.ge.s32.totalorder %s17_s24, 6  }
 0x1a8   :  { %16 = sbr.rel (!%p14_p4) target bundleno = 1 (0x1), region = 78 }

</bundles_post_ra>
